<compile_context>
chip_gen: v6e
topology: v6e:2x2x1
jax: 0.10.0
libtpu: 0.0.40
codegen_flags: <defaults>
</compile_context>

<pallas_src>
import jax
import jax.numpy as jnp
from jax.experimental import pallas as pl
from jax.experimental.pallas import tpu as pltpu


def _make_fused_kernel(n_comp):
    """Kernel over one batch tile: out = sum_i x_i @ W_i + b  (one MXU pass per piece)."""

    def kernel(*refs):
        x_refs = refs[:n_comp]
        w_refs = refs[n_comp:2 * n_comp]
        b_ref = refs[2 * n_comp]
        out_ref = refs[2 * n_comp + 1]
        acc = jnp.dot(x_refs[0][...], w_refs[0][...],
                      preferred_element_type=jnp.float32)
        for i in range(1, n_comp):
            acc = acc + jnp.dot(x_refs[i][...], w_refs[i][...],
                                preferred_element_type=jnp.float32)
        out_ref[...] = acc + b_ref[...]                       # [TB, O + N]

    return kernel


def build_fused_params(Ww_t, bw, Ws_t, bs, Wl_t, bl, Wc_t_list, bc_list,
                       dims, w, act_dtype):
    """Per-component fused weight slabs [d_i, O+N] and fused bias [1, O+N].

    Columns [0:O)  : this component's contribution to op, with BranchLayer weight
                     and LastLinear already folded in (w0 * Ww@Wl or w1 * Ws@Wl).
    Column  O + i  : CompOuts[i] weight (zero in every other component's slab).

    B-independent; hoist / cache outside the per-batch kernel path.
    """
    N = len(dims)
    O = Wl_t.shape[1]
    f32 = jnp.float32
    Wl = Wl_t.astype(f32)                                     # [H, O]
    slabs = []
    off = 0
    for i, d in enumerate(dims):
        if i < N - 1:
            op_block = w[0] * (Ww_t[off:off + d, :].astype(f32) @ Wl)   # [d, O]
            off += d
        else:
            op_block = w[1] * (Ws_t.astype(f32) @ Wl)                   # [d, O]
        comp_cols = jnp.zeros((d, N), f32).at[:, i].set(
            Wc_t_list[i][:, 0].astype(f32))                             # [d, N]
        slabs.append(jnp.concatenate([op_block, comp_cols], axis=-1)
                     .astype(act_dtype))                                # [d, O+N]
    b_op = (w[0] * bw.astype(f32) + w[1] * bs.astype(f32)) @ Wl + bl.astype(f32)
    bias = jnp.concatenate(
        [b_op] + [bc.reshape(1, 1).astype(f32) for bc in bc_list], axis=-1)  # [1, O+N]
    return slabs, bias


def _choose_batch_tile(B):
    """Large tiles to amortize per-grid-step overhead; >=2 steps for big batches
    so v7x's two TensorCores both get work (harmless on single-TC v5e/v6e)."""
    TB_MAX = 8192
    b8 = ((B + 7) // 8) * 8
    if b8 >= 4096:
        return min(TB_MAX, pl.cdiv(b8 // 8, 2) * 8)
    return b8


def simple_wave_branch(out_list, Ww_t, bw, Ws_t, bs, Wl_t, bl,
                       Wc_t_list, bc_list, prob, key, temp=10.0):
    """Pallas implementation of SimpleWaveBranch.forward.

    out_list   : list of [B, mult*D_i] activations (last entry feeds SimpleModelLinear)
    Ww_t, bw   : WaveLinear         [Dw, H], [1, H]
    Ws_t, bs   : SimpleModelLinear  [Ds, H], [1, H]
    Wl_t, bl   : LastLinear         [H, O],  [1, O]
    Wc_t_list  : CompOuts[i] weight [d_i, 1]
    bc_list    : CompOuts[i] bias   [1, 1]
    prob       : BranchLayer.prob   [2]
    Returns (op [B], Outs list of [B], branch_weights [2]).
    """
    N = len(out_list)
    dims = [int(o.shape[-1]) for o in out_list]
    B = out_list[0].shape[0]
    O = Wl_t.shape[1]
    P = O + N
    act_dtype = out_list[0].dtype        # no blanket f32 cast of activations

    # --- BranchLayer: gumbel-softmax branch weights (hard=False) ---------------
    g = jax.random.gumbel(key, prob.shape, dtype=jnp.float32)
    w = jax.nn.softmax((prob.astype(jnp.float32) + g) / jnp.float32(temp))  # [2]

    # --- Fused (LastLinear + BranchLayer + CompOuts) weight slabs --------------
    slabs, bias = build_fused_params(Ww_t, bw, Ws_t, bs, Wl_t, bl,
                                     Wc_t_list, bc_list, dims, w, act_dtype)

    # --- Batch tiling: no HBM pad; ragged last tile handled by Pallas ----------
    TB = _choose_batch_tile(B)
    grid = (pl.cdiv(B, TB),)

    x_specs = [pl.BlockSpec((TB, d), lambda i: (i, 0)) for d in dims]   # tiled batch
    w_specs = [pl.BlockSpec((d, P), lambda i: (0, 0)) for d in dims]    # resident
    b_spec = pl.BlockSpec((1, P), lambda i: (0, 0))                     # resident

    slab = pl.pallas_call(
        _make_fused_kernel(N),
        out_shape=jax.ShapeDtypeStruct((B, P), jnp.float32),
        grid=grid,
        in_specs=x_specs + w_specs + [b_spec],
        out_specs=pl.BlockSpec((TB, P), lambda i: (i, 0)),
        compiler_params=pltpu.CompilerParams(
            dimension_semantics=("parallel",)),
    )(*out_list, *slabs, bias)

    op = slab[:, :O]
    if O == 1:                                   # matches torch .squeeze(-1)
        op = jnp.squeeze(op, -1)
    Outs = [slab[:, O + i] for i in range(N)]    # each [B] (CompOuts out dim is 1)
    # TODO(synk): wandblog() (wandb.log of branch weights / tau) is host-side
    # logging with no kernel equivalent; branch weights are returned instead.
    return op, Outs, w


if __name__ == "__main__":
    # Module config (small, consistent with the forward pass):
    input_size_all = [8, 8, 16]        # last component feeds SimpleModelLinear
    hidden_size = 32
    out_size = 1
    bidirectional = True
    mult = 2 if bidirectional else 1
    temp = 10.0                        # self.temp
    B = 8
    N = len(input_size_all)
    dims = [mult * d for d in input_size_all]   # per-component feature widths
    Dw = sum(dims[:-1])                          # WaveLinear fan-in  (32)
    Ds = dims[-1]                                # SimpleModelLinear fan-in (32)

    key = jax.random.PRNGKey(0)
    k_in, k_ww, k_ws, k_wl, k_wc, k_g = jax.random.split(key, 6)

    # Deterministic inputs: list of per-component tensors [B, mult*D_i]
    in_keys = jax.random.split(k_in, N)
    out_list = [jax.random.normal(in_keys[i], (B, dims[i]), jnp.float32)
                for i in range(N)]

    # Deterministic parameters (nn.Linear-style uniform init), stored transposed.
    def linear_init(k, fan_in, fan_out):
        kw, kb = jax.random.split(k)
        bound = 1.0 / jnp.sqrt(jnp.float32(fan_in))
        w_t = jax.random.uniform(kw, (fan_in, fan_out), jnp.float32, -bound, bound)
        b = jax.random.uniform(kb, (1, fan_out), jnp.float32, -bound, bound)
        return w_t, b

    Ww_t, bw = linear_init(k_ww, Dw, hidden_size)          # WaveLinear
    Ws_t, bs = linear_init(k_ws, Ds, hidden_size)          # SimpleModelLinear
    Wl_t, bl = linear_init(k_wl, hidden_size, out_size)    # LastLinear
    wc_keys = jax.random.split(k_wc, N)
    Wc_list, bc_list = [], []
    for i in range(N):                                     # CompOuts[i]: Linear(d_i, 1)
        wc, bc = linear_init(wc_keys[i], dims[i], 1)
        Wc_list.append(wc)
        bc_list.append(bc)

    prob = jnp.ones((2,), jnp.float32)                     # BranchLayer.prob init

    op, Outs, w = simple_wave_branch(out_list, Ww_t, bw, Ws_t, bs, Wl_t, bl,
                                     Wc_list, bc_list, prob, k_g, temp)
    op = jax.block_until_ready(op)
    Outs = [jax.block_until_ready(o) for o in Outs]

    # Pure-JAX reference (same gumbel sample / branch weights).
    wave = jnp.concatenate(out_list[:-1], axis=-1)
    h_wave = wave @ Ww_t + bw
    h_simp = out_list[-1] @ Ws_t + bs
    op_h = w[0] * h_wave + w[1] * h_simp
    op_ref = jnp.squeeze(op_h @ Wl_t + bl, -1)
    outs_ref = [jnp.squeeze(out_list[i] @ Wc_list[i] + bc_list[i], -1)
                for i in range(N)]

    assert jnp.allclose(op, op_ref, atol=1e-5), "op mismatch"
    for o, r in zip(Outs, outs_ref):
        assert jnp.allclose(o, r, atol=1e-5), "Outs mismatch"

    print("KERNEL_OK")
</pallas_src>

<mosaic_0001>
module attributes {stable_mosaic.version = 11 : i64} {
  func.func @kernel(%arg0: i32, %arg1: memref<8x16xf32, #tpu.memory_space<vmem>>, %arg2: memref<8x16xf32, #tpu.memory_space<vmem>>, %arg3: memref<8x32xf32, #tpu.memory_space<vmem>>, %arg4: memref<16x4xf32, #tpu.memory_space<vmem>>, %arg5: memref<16x4xf32, #tpu.memory_space<vmem>>, %arg6: memref<32x4xf32, #tpu.memory_space<vmem>>, %arg7: memref<1x4xf32, #tpu.memory_space<vmem>>, %arg8: memref<8x4xf32, #tpu.memory_space<vmem>>) attributes {dimension_semantics = [#tpu.dimension_semantics<parallel>], iteration_bounds = array<i64: 1>, scalar_prefetch = 0 : i64, scratch_operands = 0 : i64, tpu.core_type = #tpu.core_type<tc>, window_params = [{transform_indices = @transform_0, window_bounds = array<i64: 8, 16>}, {transform_indices = @transform_1, window_bounds = array<i64: 8, 16>}, {transform_indices = @transform_2, window_bounds = array<i64: 8, 32>}, {pipeline_mode = #tpu.pipeline_mode<synchronous>, transform_indices = @transform_3, window_bounds = array<i64: 16, 4>}, {pipeline_mode = #tpu.pipeline_mode<synchronous>, transform_indices = @transform_4, window_bounds = array<i64: 16, 4>}, {pipeline_mode = #tpu.pipeline_mode<synchronous>, transform_indices = @transform_5, window_bounds = array<i64: 32, 4>}, {pipeline_mode = #tpu.pipeline_mode<synchronous>, transform_indices = @transform_6, window_bounds = array<i64: 1, 4>}, {transform_indices = @transform_7, window_bounds = array<i64: 8, 4>}]} {
    %c0 = arith.constant 0 : index
    %c0_0 = arith.constant 0 : index
    %0 = vector.load %arg1[%c0, %c0_0] : memref<8x16xf32, #tpu.memory_space<vmem>>, vector<8x16xf32>
    %c0_1 = arith.constant 0 : index
    %c0_2 = arith.constant 0 : index
    %1 = vector.load %arg4[%c0_1, %c0_2] : memref<16x4xf32, #tpu.memory_space<vmem>>, vector<16x4xf32>
    %cst = arith.constant dense<0.000000e+00> : vector<8x4xf32>
    %2 = tpu.matmul %0, %1, %cst {dimension_numbers = #tpu.dot_dimension_numbers<[1], [0], [0], [1], [0, 0, 1, 1], [], []>} : vector<8x16xf32>, vector<16x4xf32>, vector<8x4xf32> -> vector<8x4xf32>
    %c0_3 = arith.constant 0 : index
    %c0_4 = arith.constant 0 : index
    %3 = vector.load %arg2[%c0_3, %c0_4] : memref<8x16xf32, #tpu.memory_space<vmem>>, vector<8x16xf32>
    %c0_5 = arith.constant 0 : index
    %c0_6 = arith.constant 0 : index
    %4 = vector.load %arg5[%c0_5, %c0_6] : memref<16x4xf32, #tpu.memory_space<vmem>>, vector<16x4xf32>
    %cst_7 = arith.constant dense<0.000000e+00> : vector<8x4xf32>
    %5 = tpu.matmul %3, %4, %cst_7 {dimension_numbers = #tpu.dot_dimension_numbers<[1], [0], [0], [1], [0, 0, 1, 1], [], []>} : vector<8x16xf32>, vector<16x4xf32>, vector<8x4xf32> -> vector<8x4xf32>
    %6 = arith.addf %2, %5 : vector<8x4xf32>
    %c0_8 = arith.constant 0 : index
    %c0_9 = arith.constant 0 : index
    %7 = vector.load %arg3[%c0_8, %c0_9] : memref<8x32xf32, #tpu.memory_space<vmem>>, vector<8x32xf32>
    %c0_10 = arith.constant 0 : index
    %c0_11 = arith.constant 0 : index
    %8 = vector.load %arg6[%c0_10, %c0_11] : memref<32x4xf32, #tpu.memory_space<vmem>>, vector<32x4xf32>
    %cst_12 = arith.constant dense<0.000000e+00> : vector<8x4xf32>
    %9 = tpu.matmul %7, %8, %cst_12 {dimension_numbers = #tpu.dot_dimension_numbers<[1], [0], [0], [1], [0, 0, 1, 1], [], []>} : vector<8x32xf32>, vector<32x4xf32>, vector<8x4xf32> -> vector<8x4xf32>
    %10 = arith.addf %6, %9 : vector<8x4xf32>
    %c0_13 = arith.constant 0 : index
    %c0_14 = arith.constant 0 : index
    %11 = vector.load %arg7[%c0_13, %c0_14] : memref<1x4xf32, #tpu.memory_space<vmem>>, vector<1x4xf32>
    %12 = vector.broadcast %11 : vector<1x4xf32> to vector<8x4xf32>
    %13 = arith.addf %10, %12 : vector<8x4xf32>
    %c0_15 = arith.constant 0 : index
    %c0_16 = arith.constant 0 : index
    %14 = vector.load %arg8[%c0_15, %c0_16] : memref<8x4xf32, #tpu.memory_space<vmem>>, vector<8x4xf32>
    tpu.vector_store %arg8[%c0_15, %c0_16], %13 {strides = array<i32>} : memref<8x4xf32, #tpu.memory_space<vmem>>, vector<8x4xf32>,
    return
  }
  func.func @transform_0(%arg0: i32) -> (i32, i32) {
    %c0_i32 = arith.constant 0 : i32
    %c0_i32_0 = arith.constant 0 : i32
    return %arg0, %c0_i32 : i32, i32
  }
  func.func @transform_1(%arg0: i32) -> (i32, i32) {
    %c0_i32 = arith.constant 0 : i32
    %c0_i32_0 = arith.constant 0 : i32
    return %arg0, %c0_i32 : i32, i32
  }
  func.func @transform_2(%arg0: i32) -> (i32, i32) {
    %c0_i32 = arith.constant 0 : i32
    %c0_i32_0 = arith.constant 0 : i32
    return %arg0, %c0_i32 : i32, i32
  }
  func.func @transform_3(%arg0: i32) -> (i32, i32) {
    %c0_i32 = arith.constant 0 : i32
    %c0_i32_0 = arith.constant 0 : i32
    %c0_i32_1 = arith.constant 0 : i32
    return %c0_i32, %c0_i32_0 : i32, i32
  }
  func.func @transform_4(%arg0: i32) -> (i32, i32) {
    %c0_i32 = arith.constant 0 : i32
    %c0_i32_0 = arith.constant 0 : i32
    %c0_i32_1 = arith.constant 0 : i32
    return %c0_i32, %c0_i32_0 : i32, i32
  }
  func.func @transform_5(%arg0: i32) -> (i32, i32) {
    %c0_i32 = arith.constant 0 : i32
    %c0_i32_0 = arith.constant 0 : i32
    %c0_i32_1 = arith.constant 0 : i32
    return %c0_i32, %c0_i32_0 : i32, i32
  }
  func.func @transform_6(%arg0: i32) -> (i32, i32) {
    %c0_i32 = arith.constant 0 : i32
    %c0_i32_0 = arith.constant 0 : i32
    %c0_i32_1 = arith.constant 0 : i32
    return %c0_i32, %c0_i32_0 : i32, i32
  }
  func.func @transform_7(%arg0: i32) -> (i32, i32) {
    %c0_i32 = arith.constant 0 : i32
    %c0_i32_0 = arith.constant 0 : i32
    return %arg0, %c0_i32 : i32, i32
  }
}

</mosaic_0001>

<bundles_post_ra>
// kernel: tpu_custom_call.1
= control target key start
LH: loop header
LB: loop body
LE: loop exit
PB: predicated region body
PF: predicated region fallthrough
CT: control target
= control target key end

     0   :  { %v315_v0 = vmov 0.0   ;;  %vm32_vm0 = vcmask 130048   ;;  %vm316_vm1 = vmmov 0   ;;  %vm184_vm2 = vcmask 261120   ;;  %s401_s4 = inlined_call_operand.vmem [shape: f32[16,4], index: 4, kind: input, shape index: {}]   ;;  %s402_s5 = inlined_call_operand.vmem [shape: f32[32,4], index: 5, kind: input, shape index: {}]   ;;  %s403_s1 = inlined_call_operand.vmem [shape: f32[8,16], index: 1, kind: input, shape index: {}]   ;;  %s404_s3 = inlined_call_operand.vmem [shape: f32[16,4], index: 3, kind: input, shape index: {}]   ;;  %s405_s0 = inlined_call_operand.vmem [shape: f32[8,16], index: 0, kind: input, shape index: {}]   ;;  %s406_s2 = inlined_call_operand.vmem [shape: f32[8,32], index: 2, kind: input, shape index: {}]   ;;  %s407_s6 = inlined_call_operand.vmem [shape: f32[1,4], index: 6, kind: input, shape index: {}]   ;;  %s408_s7 = inlined_call_operand.vmem [shape: f32[8,4], index: 7, kind: output, shape index: {}]  }
   0x1   :  { %288 = vmatprep.subr.mxu1 %v315_v0  ;;  %v31_v1 = vld [vmem:[%s401_s4 + $0x8] sm:$0xff]  ;;  %302 = vmatprep.subr.mxu0 %v315_v0  ;;  %v183_v2 = vld [vmem:[%s402_s5 + $0x18] sm:$0xff]  ;;  %v30_v3 = vld [vmem:[%s401_s4] sm:$0xff]  ;;  %vm267_vm3 = vcmask 31744  }
   0x2   :  { %289 = vmatpush3.msra.mxu1 %v31_v1  ;;  %303 = vmatpush3.msra.mxu0 %v183_v2  ;;  %v29_v4 = vld [vmem:[%s403_s1] sm:$0xff]  ;;  %v182_v5 = vld [vmem:[%s402_s5 + $0x10] sm:$0xff]  ;;  %v28_v6 = vld [vmem:[%s404_s3 + $0x8] sm:$0xff] }
   0x3   :  { %290 = vmatprep.subr.mxu1 %v315_v0  ;;  %292 = vmatprep.mubr.msk.f32.mxu1 %vm316_vm1, %v315_v0  ;;  %v181_v7 = vld [vmem:[%s402_s5 + $0x8] sm:$0xff]  ;;  %v27_v8 = vld [vmem:[%s404_s3] sm:$0xff] }
   0x4   :  { %291 = vmatpush3.msra.mxu1 %v30_v3  ;;  %304 = vmatprep.subr.mxu0 %v315_v0  ;;  %v26_v9 = vld [vmem:[%s405_s0] sm:$0xff] }
   0x5   :  { %293 = vmatmul.mubr.msk.f32.vlgmr.msra.gmra.mxu1 %vm32_vm0, %v29_v4  ;;  %295 = vmatprep.subr.mxu1 %v315_v0  ;;  %v180_v10 = vld [vmem:[%s402_s5] sm:$0xff] }
   0x6   :  { %305 = vmatpush3.msra.mxu0 %v182_v5  ;;  %296 = vmatpush3.msra.mxu1 %v28_v6  ;;  %v179_v11 = vld [vmem:[%s406_s2] sm:$0xff] }
   0x7   :  { %306 = vmatprep.subr.mxu0 %v315_v0  ;;  %297 = vmatprep.subr.mxu1 %v315_v0  ;;  %v276_v17 = vld [vmem:[%s407_s6] ss:$0 sm:$0xff] }
   0x8   :  { %307 = vmatpush3.msra.mxu0 %v181_v7  ;;  %298 = vmatpush3.msra.mxu1 %v27_v8 }
   0x9   :  { %299 = vmatprep.mubr.msk.f32.mxu1 %vm316_vm1, %v315_v0  ;;  %308 = vmatprep.subr.mxu0 %v315_v0 }
   0xa   :  { %300 = vmatmul.mubr.msk.f32.vlgmr.msra.gmra.mxu1 %vm32_vm0, %v26_v9  ;;  %309 = vmatpush3.msra.mxu0 %v180_v10 }
   0xb   :  { %310 = vmatprep.mubr.msk.f32.mxu0 %vm316_vm1, %v315_v0 }
   0xc   :  { %311 = vmatmul.mubr.msk.f32.vlgmr.msra.gmra.mxu0 %vm184_vm2, %v179_v11 }
  0xc5   :  { %v102_v12 = vpop.f32.mrf.mxu1 }
  0xc7   :  { %v294_v13 = vpop.f32.mrf.mxu1 }
  0xca   :  { %v175_v14 = vpop.f32.mrf.mxu1 }
  0xcb   :  { %v176_v15 = vadd.f32 %v175_v14, %v102_v12 }
  0xcc   :  { %v254_v16 = vpop.f32.mrf.mxu0  ;;  %v301_v18 = vpop.f32.mrf.mxu1 }
  0xcd   :  { %v258_v19 = vadd.f32 %v254_v16, %v176_v15 }
  0xce   :  { %v312_v20 = vpop.f32.mrf.mxu0 }
  0xcf   :  { %v266_v21 = vadd.f32 %v276_v17, %v258_v19 }
  0xd1   :  { %268 = vst.msk [vmem:[%s408_s7] sm:$0xff] %vm267_vm3, %v266_v21 }

</bundles_post_ra>
